<compile_context>
chip_gen: v7x
topology: tpu7x:2x2x1
jax: 0.10.0
libtpu: 0.0.40
codegen_flags: <defaults>
</compile_context>

<pallas_src>
import math
import functools

import jax
import jax.numpy as jnp
from jax.experimental import pallas as pl
from jax.experimental.pallas import tpu as pltpu


def _pe_dropout_kernel(seed_ref, x_ref, pe_ref, o_ref, *,
                       keep_prob, training, tile_cols, total_cols):
    # x_ref:  (B, TC) lane-dense block of the flattened (B, S*D) input
    # pe_ref: (1, TC) matching slice of the flattened positional table
    y = x_ref[...] + pe_ref[...]            # (1, TC) broadcasts along sublanes

    if training and 0.0 < keep_prob < 1.0:
        c = pl.program_id(0)                # column-tile index
        rows, cols = x_ref.shape

        # Global element index (independent of tiling) -> counter-based hash.
        row_idx = jax.lax.broadcasted_iota(jnp.int32, (rows, cols), 0)
        col_idx = jax.lax.broadcasted_iota(jnp.int32, (rows, cols), 1)
        idx = row_idx * total_cols + (col_idx + c * tile_cols)

        h = idx.astype(jnp.uint32)
        h = h ^ (seed_ref[0].astype(jnp.uint32) * jnp.uint32(0x9E3779B9))
        # murmur3-style finalizer (wraps mod 2^32, which is what we want)
        h = h ^ (h >> 16)
        h = h * jnp.uint32(0x85EBCA6B)
        h = h ^ (h >> 13)
        h = h * jnp.uint32(0xC2B2AE35)
        h = h ^ (h >> 16)

        # 24-bit uniform value, compared against keep_prob * 2^24 (signed-safe).
        r24 = (h >> 8).astype(jnp.int32)
        thresh = jnp.int32(int(keep_prob * (1 << 24)))
        keep = r24 < thresh

        y = jnp.where(keep, y * jnp.float32(1.0 / keep_prob), jnp.float32(0.0))
    elif training and keep_prob <= 0.0:
        # dropout_p == 1.0: everything is dropped (avoid 1/0 scaling path).
        y = jnp.zeros_like(y)

    o_ref[...] = y.astype(o_ref.dtype)


def make_positional_encoding_table(d_model, max_len=5000, dtype=jnp.float32):
    """Same construction as the PyTorch module's `pe` buffer: (max_len, d_model)."""
    position = jnp.arange(0, max_len, dtype=jnp.float32)[:, None]            # (L, 1)
    div_term = jnp.exp(
        jnp.arange(0, d_model, 2, dtype=jnp.float32) * (-math.log(10000.0) / d_model)
    )                                                                         # (D/2,)
    angles = position * div_term                                              # (L, D/2)
    pe = jnp.zeros((max_len, d_model), dtype=jnp.float32)
    pe = pe.at[:, 0::2].set(jnp.sin(angles))
    pe = pe.at[:, 1::2].set(jnp.cos(angles))
    return pe.astype(dtype)


def positional_encoding(x, pe_table, *, dropout_p=0.1, training=True, seed=0):
    """x: (B, S, D).  Returns dropout(x + pe[:S]) with inverted-dropout scaling."""
    B, S, D = x.shape
    total_cols = S * D

    # Lane-dense 2-D layout (free reshapes in the wrapper).
    x2 = x.reshape(B, total_cols)
    pe2 = pe_table[:S, :].reshape(1, total_cols).astype(x.dtype)

    # Column tile: multiple of 128 lanes, ~2 MiB per x block so double-buffered
    # x + out + pe blocks stay far under the 16 MiB v5e scoped-VMEM default
    # (and trivially under v6e/v7x budgets), independent of S.
    LANE = 128
    itemsize = jnp.dtype(x.dtype).itemsize
    target_block_bytes = 2 * 1024 * 1024
    tc = (target_block_bytes // (itemsize * max(B, 1))) // LANE * LANE
    tc = max(LANE, tc)
    if tc >= total_cols:
        tc = total_cols                      # single full-extent block
    grid = (pl.cdiv(total_cols, tc),)

    keep_prob = 1.0 - float(dropout_p)
    seed_arr = jnp.array([seed], dtype=jnp.int32)

    kernel = functools.partial(
        _pe_dropout_kernel,
        keep_prob=keep_prob, training=training,
        tile_cols=tc, total_cols=total_cols,
    )

    out2 = pl.pallas_call(
        kernel,
        out_shape=jax.ShapeDtypeStruct((B, total_cols), x.dtype),
        grid_spec=pltpu.PrefetchScalarGridSpec(
            num_scalar_prefetch=1,           # seed -> SMEM
            grid=grid,
            in_specs=[
                pl.BlockSpec((B, tc), lambda c, seed: (0, c)),   # x
                pl.BlockSpec((1, tc), lambda c, seed: (0, c)),   # pe
            ],
            out_specs=pl.BlockSpec((B, tc), lambda c, seed: (0, c)),
        ),
        compiler_params=pltpu.CompilerParams(
            dimension_semantics=("parallel",),   # tiles independent -> v7x megacore
        ),
        cost_estimate=pl.CostEstimate(
            flops=5 * B * total_cols,
            transcendentals=0,
            bytes_accessed=(2 * B * total_cols + total_cols) * itemsize,
        ),
    )(seed_arr, x2, pe2)

    return out2.reshape(B, S, D)


if __name__ == "__main__":
    B, S, D = 2, 8, 32            # small shapes consistent with the module
    key = jax.random.PRNGKey(0)
    x = jax.random.normal(key, (B, S, D), dtype=jnp.float32)

    pe_table = make_positional_encoding_table(d_model=D, max_len=5000)

    # Eval-mode forward (dropout = identity): exact reference check.
    out_eval = positional_encoding(x, pe_table, dropout_p=0.1, training=False)
    out_eval = jax.block_until_ready(out_eval)
    ref = x + pe_table[None, :S, :]
    assert out_eval.shape == (B, S, D)
    assert jnp.allclose(out_eval, ref, atol=1e-5), "eval-mode mismatch vs reference"

    # Training-mode forward: every element is either dropped (0) or kept and
    # scaled by 1/keep_prob.
    out_train = positional_encoding(x, pe_table, dropout_p=0.1, training=True, seed=42)
    out_train = jax.block_until_ready(out_train)
    keep_prob = 0.9
    scaled_ref = ref / keep_prob
    ok = jnp.all((jnp.abs(out_train) < 1e-12) |
                 (jnp.abs(out_train - scaled_ref) < 1e-4))
    assert out_train.shape == (B, S, D)
    assert bool(ok), "training-mode dropout output mismatch"

    print("KERNEL_OK")
</pallas_src>

<mosaic_0001>
module attributes {stable_mosaic.version = 11 : i64} {
  func.func @_pe_dropout_kernel(%arg0: i32, %arg1: memref<1xi32, #tpu.memory_space<smem>>, %arg2: memref<2x256xf32, #tpu.memory_space<vmem>>, %arg3: memref<1x256xf32, #tpu.memory_space<vmem>>, %arg4: memref<2x256xf32, #tpu.memory_space<vmem>>) attributes {dimension_semantics = [#tpu.dimension_semantics<parallel>], iteration_bounds = array<i64: 1>, scalar_prefetch = 1 : i64, scratch_operands = 0 : i64, tpu.core_type = #tpu.core_type<tc>, window_params = [{transform_indices = @transform_0, window_bounds = array<i64: 2, 256>}, {transform_indices = @transform_1, window_bounds = array<i64: 1, 256>}, {transform_indices = @transform_2, window_bounds = array<i64: 2, 256>}]} {
    %c0 = arith.constant 0 : index
    %c0_0 = arith.constant 0 : index
    %0 = vector.load %arg2[%c0, %c0_0] : memref<2x256xf32, #tpu.memory_space<vmem>>, vector<2x256xf32>
    %c0_1 = arith.constant 0 : index
    %c0_2 = arith.constant 0 : index
    %1 = vector.load %arg3[%c0_1, %c0_2] : memref<1x256xf32, #tpu.memory_space<vmem>>, vector<1x256xf32>
    %2 = vector.broadcast %1 : vector<1x256xf32> to vector<2x256xf32>
    %3 = arith.addf %0, %2 : vector<2x256xf32>
    %c0_3 = arith.constant 0 : index
    %c0_4 = arith.constant 0 : index
    %4 = vector.load %arg4[%c0_3, %c0_4] : memref<2x256xf32, #tpu.memory_space<vmem>>, vector<2x256xf32>
    tpu.vector_store %arg4[%c0_3, %c0_4], %3 {strides = array<i32>} : memref<2x256xf32, #tpu.memory_space<vmem>>, vector<2x256xf32>,
    return
  }
  func.func @transform_0(%arg0: i32, %arg1: memref<1xi32, #tpu.memory_space<smem>>) -> (i32, i32) {
    %c0_i32 = arith.constant 0 : i32
    %c0_i32_0 = arith.constant 0 : i32
    return %c0_i32, %arg0 : i32, i32
  }
  func.func @transform_1(%arg0: i32, %arg1: memref<1xi32, #tpu.memory_space<smem>>) -> (i32, i32) {
    %c0_i32 = arith.constant 0 : i32
    %c0_i32_0 = arith.constant 0 : i32
    return %c0_i32, %arg0 : i32, i32
  }
  func.func @transform_2(%arg0: i32, %arg1: memref<1xi32, #tpu.memory_space<smem>>) -> (i32, i32) {
    %c0_i32 = arith.constant 0 : i32
    %c0_i32_0 = arith.constant 0 : i32
    return %c0_i32, %arg0 : i32, i32
  }
}

</mosaic_0001>

<bundles_post_ra>
// kernel: tpu_custom_call.1
= control target key start
LH: loop header
LB: loop body
LE: loop exit
PB: predicated region body
PF: predicated region fallthrough
CT: control target
= control target key end

     0   :  { %9 = vsyncpa [#allocation5], 0  ;;  %s164_s0 = inlined_call_operand.<no memory space> [shape: s32[1], index: 0, kind: input, shape index: {}]   ;;  %s165_s1 = inlined_call_operand.hbm [shape: f32[2,256], index: 1, kind: input, shape index: {}]   ;;  %s166_s2 = inlined_call_operand.vmem [shape: f32[1,256], index: 2, kind: input, shape index: {}]   ;;  %s167_s3 = inlined_call_operand.hbm [shape: f32[2,256], index: 3, kind: output, shape index: {}]  }
   0x1   :  { %10 = vsyncpa [#allocation6], 0  ;;  %s114_s12 = smov [#allocation4]   ;;  %s66_s16 = scalar_lea.hbm %s165_s1, 64 }
   0x2   :  { %s17_s13 = sshll.u32 %s114_s12, 4  ;;  %p67_p0 = scmp.ne.s32.totalorder %s165_s1, %s66_s16  ;;  %s18_s13 = int_to_ptr.vmem [resolvable:$true] %s17_s13 }
   0x3   :  { %p70_p1 = scmp.lt.u32.totalorder %s66_s16, %s165_s1 }
   0x5   :  { %p72_p2 = pnand %p70_p1, %p67_p0 }
   0x7   :  { %75 = shalt.err (!%p72_p2)
}
   0x8   :  { %s76_s20 = scalar_lea.vmem %s18_s13, 64  ;;  %p81_p4 = scmp.lt.s32.totalorder %s18_s13, %s18_s13 }
   0x9   :  { %p77_p3 = scmp.ne.s32.totalorder %s18_s13, %s76_s20  ;;  %p82_p5 = scmp.lt.s32.totalorder %s76_s20, %s76_s20 }
   0xb   :  { %p83_p6 = por %p82_p5, %p81_p4 }
   0xd   :  { %p84_p7 = pnand %p83_p6, %p77_p3 }
   0xf   :  { %87 = shalt.err (!%p84_p7)
}
  0x10   :  { %20 = dma.hbm_to_vmem [thread:$0]  %s165_s1, 64, %s18_s13, [#allocation5]  }
  0x11   :  { %110 = dma.done.wait [#allocation5], 64  }
  0x12   :  { %111 = vsyncadd [#allocation5], 4294967232  ;;  %v29_v0 = vlaneseq  ;;  %v115_v1 = vmov 1983009808   ;;  %v27_v7 = vld [vmem:[%s166_s2] sm:$0x3] }
  0x13   :  { %v39_v2 = vunpack.c.l.s4 %v115_v1  ;;  %v26_v12 = vld [vmem:[#allocation4] sm:$0xf]  ;;  %s116_s25 = smov [#allocation7]  }
  0x14   :  { %v30_v3 = vshrl.u32 %v29_v0, 7  ;;  %s54_s1 = sshll.u32 %s116_s25, 4  ;;  %s55_s1 = int_to_ptr.vmem [resolvable:$true] %s54_s1 }
  0x15   :  { %v40_v6 = vunpack.c.0.s8 %v39_v2  ;;  %s88_s26 = scalar_lea.vmem %s55_s1, 64  ;;  %p93_p9 = scmp.lt.s32.totalorder %s55_s1, %s55_s1 }
  0x16   :  { %v31_v4 = vsub.s32 0, %v30_v3  ;;  %v35_v5 = vsub.s32 1, %v30_v3  ;;  %p89_p8 = scmp.ne.s32.totalorder %s55_s1, %s88_s26  ;;  %p94_p10 = scmp.lt.s32.totalorder %s88_s26, %s88_s26 }
  0x17   :  { %v43_v10 = vsub.s32 %v40_v6, %v30_v3 }
  0x18   :  { %v32_v8 = vrot.slane %v27_v7, %v31_v4  ;;  %v36_v9 = vrot.slane %v27_v7, %v35_v5  ;;  %p95_p11 = por %p94_p10, %p93_p9 }
  0x1a   :  { %v37_v11 = vcombine.low %v32_v8, %v36_v9  ;;  %p96_p12 = pnand %p95_p11, %p89_p8 }
  0x1c   :  { %v44_v13 = vrot.slane %v37_v11, %v43_v10 }
  0x1e   :  { %v46_v14 = vadd.f32 %v44_v13, %v26_v12 }
  0x20   :  { %47 = vst [vmem:[#allocation7] sm:$0xf] %v46_v14 }
  0x21   :  { %99 = shalt.err (!%p96_p12)
}
  0x22   :  { %s100_s28 = scalar_lea.hbm %s167_s3, 64 }
  0x23   :  { %p101_p13 = scmp.ne.s32.totalorder %s167_s3, %s100_s28  ;;  %p104_p0 = scmp.lt.u32.totalorder %s100_s28, %s167_s3 }
  0x25   :  { %p106_p1 = pnand %p104_p0, %p101_p13 }
  0x27   :  { %109 = shalt.err (!%p106_p1)
}
  0x28   :  { %57 = dma.vmem_to_hbm [thread:$0]  %s55_s1, 64, %s167_s3, [#allocation6]  }
  0x29   :  { %112 = dma.done.wait [#allocation6], 64  }
  0x2a   :  { %113 = vsyncadd [#allocation6], 4294967232 }
  0x2b   :  { %61 = vsyncpa [#allocation5], 1 }
  0x2c   :  { %62 = vsyncpa [#allocation6], 1 }

</bundles_post_ra>
